<compile_context>
chip_gen: v7x
topology: tpu7x:2x2x1
jax: 0.10.0
libtpu: 0.0.40
codegen_flags: <defaults>
</compile_context>

<pallas_src>
import functools
from math import sqrt

import jax
import jax.numpy as jnp
import numpy as np
from jax.experimental import pallas as pl
from jax.experimental.pallas import tpu as pltpu


# ----------------------------------------------------------------------------
# Kernel 1: LayerNorm1 + multi-head self-attention + residual
# ----------------------------------------------------------------------------
def _attention_kernel(x_ref, wqkv_ref, bqkv_ref, wo_ref, bo_ref, out_ref,
                      *, num_heads, eps, scale):
    x = x_ref[0]                                  # (S, D) f32  (residual source)
    S, D = x.shape
    hd = D // num_heads

    # LayerNorm (gamma/beta already folded into wqkv/bqkv by the wrapper).
    mu = jnp.mean(x, axis=-1, keepdims=True)
    xc = x - mu
    var = jnp.mean(xc * xc, axis=-1, keepdims=True)
    nrm = xc * jax.lax.rsqrt(var + eps)           # (S, D) f32

    # Fused Q/K/V projection: one (S, D) @ (D, 3D) bf16 MXU matmul, f32 acc.
    qkv = jnp.dot(nrm.astype(jnp.bfloat16), wqkv_ref[...],
                  preferred_element_type=jnp.float32) + bqkv_ref[...]
    q = qkv[:, 0 * D:1 * D]
    k = qkv[:, 1 * D:2 * D]
    v = qkv[:, 2 * D:3 * D]

    # Per-head attention; O-projection accumulated from row-blocks of W_o so we
    # never need to concatenate head outputs along the lane dimension.
    o = jnp.zeros((S, D), dtype=jnp.float32)
    for h in range(num_heads):
        lo, hi = h * hd, (h + 1) * hd
        qh = q[:, lo:hi].astype(jnp.bfloat16)
        kh = k[:, lo:hi].astype(jnp.bfloat16)
        vh = v[:, lo:hi].astype(jnp.bfloat16)

        # scores = q @ k^T / sqrt(embed_dim)   (spec scales by sqrt(hidden)!)
        s = jax.lax.dot_general(qh, kh, (((1,), (1,)), ((), ())),
                                preferred_element_type=jnp.float32) * scale
        m = jnp.max(s, axis=-1, keepdims=True)
        p = jnp.exp(s - m)
        p = p / jnp.sum(p, axis=-1, keepdims=True)          # (S, S) f32
        # attention dropout: p = 0.0 in this config -> identity.

        oh = jnp.dot(p.astype(jnp.bfloat16), vh,
                     preferred_element_type=jnp.float32)    # (S, hd) f32
        o = o + jnp.dot(oh.astype(jnp.bfloat16), wo_ref[lo:hi, :],
                        preferred_element_type=jnp.float32)

    out_ref[0] = (x + o + bo_ref[...]).astype(out_ref.dtype)


# ----------------------------------------------------------------------------
# Kernel 2: LayerNorm2 + MLP (fc1 -> GELU -> fc2) + residual, seq-tiled
# ----------------------------------------------------------------------------
def _mlp_kernel(x_ref, w1_ref, b1_ref, w2_ref, b2_ref, out_ref, *, eps):
    x = x_ref[0]                                  # (TS, D) f32

    mu = jnp.mean(x, axis=-1, keepdims=True)
    xc = x - mu
    var = jnp.mean(xc * xc, axis=-1, keepdims=True)
    nrm = xc * jax.lax.rsqrt(var + eps)           # LN2 affine folded into fc1

    h = jnp.dot(nrm.astype(jnp.bfloat16), w1_ref[...],
                preferred_element_type=jnp.float32) + b1_ref[...]

    # tanh-approx GELU (runs on VPU/EUP).  nn.GELU() is the exact erf form;
    # the approximation differs by < 1e-3 abs, well below the bf16 noise floor.
    c = jnp.float32(0.7978845608028654)           # sqrt(2/pi)
    g = 0.5 * h * (1.0 + jnp.tanh(c * (h + 0.044715 * h * h * h)))

    y = jnp.dot(g.astype(jnp.bfloat16), w2_ref[...],
                preferred_element_type=jnp.float32) + b2_ref[...]
    out_ref[0] = (x + y).astype(out_ref.dtype)


# ----------------------------------------------------------------------------
# Wrapper
# ----------------------------------------------------------------------------
def siglip_encoder_layer(x, params, *, num_heads, eps=1e-6, seq_tile=8):
    """x: (B, S, D) float. Returns (B, S, D) float32."""
    B, S, D = x.shape
    inter = params["w_fc1"].shape[1]
    scale = 1.0 / sqrt(D)                         # spec divides by sqrt(embed_dim)
    f32, bf16 = jnp.float32, jnp.bfloat16

    # --- fold LN1 affine into the concatenated QKV projection -----------------
    wqkv = jnp.concatenate(
        [params["w_q"], params["w_k"], params["w_v"]], axis=1).astype(f32)  # (D,3D)
    bqkv = jnp.concatenate(
        [params["b_q"], params["b_k"], params["b_v"]], axis=0).astype(f32)  # (3D,)
    g1 = params["ln1_g"].astype(f32)
    b1 = params["ln1_b"].astype(f32)
    wqkv_eff = (g1[:, None] * wqkv).astype(bf16)
    bqkv_eff = (b1 @ wqkv + bqkv).reshape(1, 3 * D).astype(f32)
    wo = params["w_o"].astype(bf16)
    bo = params["b_o"].astype(f32).reshape(1, D)

    attn_fn = functools.partial(_attention_kernel,
                                num_heads=num_heads, eps=eps, scale=scale)
    x2 = pl.pallas_call(
        attn_fn,
        out_shape=jax.ShapeDtypeStruct((B, S, D), jnp.float32),
        grid_spec=pltpu.PrefetchScalarGridSpec(
            num_scalar_prefetch=0,
            grid=(B,),
            in_specs=[
                pl.BlockSpec((1, S, D), lambda b: (b, 0, 0)),
                pl.BlockSpec((D, 3 * D), lambda b: (0, 0)),
                pl.BlockSpec((1, 3 * D), lambda b: (0, 0)),
                pl.BlockSpec((D, D), lambda b: (0, 0)),
                pl.BlockSpec((1, D), lambda b: (0, 0)),
            ],
            out_specs=pl.BlockSpec((1, S, D), lambda b: (b, 0, 0)),
        ),
        compiler_params=pltpu.CompilerParams(
            dimension_semantics=("parallel",)),
    )(x.astype(f32), wqkv_eff, bqkv_eff, wo, bo)

    # --- fold LN2 affine into fc1 ---------------------------------------------
    w1 = params["w_fc1"].astype(f32)
    g2 = params["ln2_g"].astype(f32)
    b2 = params["ln2_b"].astype(f32)
    w1_eff = (g2[:, None] * w1).astype(bf16)
    b1_eff = (b2 @ w1 + params["b_fc1"].astype(f32)).reshape(1, inter)
    w2 = params["w_fc2"].astype(bf16)
    b2_fc = params["b_fc2"].astype(f32).reshape(1, D)

    ts = min(seq_tile, S)
    assert S % ts == 0, "seq_tile must divide the sequence length"
    mlp_fn = functools.partial(_mlp_kernel, eps=eps)
    out = pl.pallas_call(
        mlp_fn,
        out_shape=jax.ShapeDtypeStruct((B, S, D), jnp.float32),
        grid_spec=pltpu.PrefetchScalarGridSpec(
            num_scalar_prefetch=0,
            grid=(B, S // ts),
            in_specs=[
                pl.BlockSpec((1, ts, D), lambda b, s: (b, s, 0)),
                pl.BlockSpec((D, inter), lambda b, s: (0, 0)),
                pl.BlockSpec((1, inter), lambda b, s: (0, 0)),
                pl.BlockSpec((inter, D), lambda b, s: (0, 0)),
                pl.BlockSpec((1, D), lambda b, s: (0, 0)),
            ],
            out_specs=pl.BlockSpec((1, ts, D), lambda b, s: (b, s, 0)),
        ),
        compiler_params=pltpu.CompilerParams(
            dimension_semantics=("parallel", "parallel")),
    )(x2, w1_eff, b1_eff, w2, b2_fc)
    return out


# ----------------------------------------------------------------------------
# Pure-JAX f32 reference matching the PyTorch forward semantics
# ----------------------------------------------------------------------------
def _reference(x, params, *, num_heads, eps):
    f32 = jnp.float32
    x = x.astype(f32)

    def ln(v, g, b):
        mu = v.mean(-1, keepdims=True)
        var = jnp.mean((v - mu) ** 2, -1, keepdims=True)
        return (v - mu) / jnp.sqrt(var + eps) * g + b

    B, S, D = x.shape
    hd = D // num_heads
    h = ln(x, params["ln1_g"], params["ln1_b"])
    q = h @ params["w_q"] + params["b_q"]
    k = h @ params["w_k"] + params["b_k"]
    v = h @ params["w_v"] + params["b_v"]
    q = q.reshape(B, S, num_heads, hd).transpose(0, 2, 1, 3)
    k = k.reshape(B, S, num_heads, hd).transpose(0, 2, 1, 3)
    v = v.reshape(B, S, num_heads, hd).transpose(0, 2, 1, 3)
    s = jnp.einsum("bhqd,bhkd->bhqk", q, k) / sqrt(D)   # spec: / sqrt(embed_dim)
    p = jax.nn.softmax(s, axis=-1)
    o = jnp.einsum("bhqk,bhkd->bhqd", p, v)
    o = o.transpose(0, 2, 1, 3).reshape(B, S, D)
    attn = o @ params["w_o"] + params["b_o"]
    x2 = x + attn
    h2 = ln(x2, params["ln2_g"], params["ln2_b"])
    m = jax.nn.gelu(h2 @ params["w_fc1"] + params["b_fc1"], approximate=False)
    mlp = m @ params["w_fc2"] + params["b_fc2"]
    return x2 + mlp


if __name__ == "__main__":
    # Small, module-consistent config: seq=16 patches, hidden=32, 4 heads,
    # intermediate=64, batch=2 (real SigLIP: hidden=768, heads=12, inter=3072).
    batch, seq, hidden, heads, inter = 2, 16, 32, 4, 64
    eps = 1e-6

    key = jax.random.PRNGKey(0)
    keys = jax.random.split(key, 18)

    def w(k, shape, s=0.1):
        return jax.random.normal(k, shape, jnp.float32) * s

    x = jax.random.normal(keys[0], (batch, seq, hidden), jnp.float32)
    params = dict(
        ln1_g=1.0 + w(keys[1], (hidden,), 0.05),
        ln1_b=w(keys[2], (hidden,), 0.05),
        ln2_g=1.0 + w(keys[3], (hidden,), 0.05),
        ln2_b=w(keys[4], (hidden,), 0.05),
        w_q=w(keys[5], (hidden, hidden)), b_q=w(keys[6], (hidden,)),
        w_k=w(keys[7], (hidden, hidden)), b_k=w(keys[8], (hidden,)),
        w_v=w(keys[9], (hidden, hidden)), b_v=w(keys[10], (hidden,)),
        w_o=w(keys[11], (hidden, hidden)), b_o=w(keys[12], (hidden,)),
        w_fc1=w(keys[13], (hidden, inter)), b_fc1=w(keys[14], (inter,)),
        w_fc2=w(keys[15], (inter, hidden)), b_fc2=w(keys[16], (hidden,)),
    )

    out = siglip_encoder_layer(x, params, num_heads=heads, eps=eps, seq_tile=8)
    out = jax.block_until_ready(out)

    ref = _reference(x, params, num_heads=heads, eps=eps)
    # bf16 matmul operands + tanh-GELU => loosened tolerance vs the f32 reference.
    np.testing.assert_allclose(np.asarray(out), np.asarray(ref),
                               rtol=3e-2, atol=3e-2)
    assert out.shape == (batch, seq, hidden)
    print("KERNEL_OK")
</pallas_src>

<mosaic_0001>
module attributes {stable_mosaic.version = 11 : i64} {
  func.func @_attention_kernel(%arg0: i32, %arg1: memref<1x16x32xf32, #tpu.memory_space<vmem>>, %arg2: memref<32x96xbf16, #tpu.memory_space<vmem>>, %arg3: memref<1x96xf32, #tpu.memory_space<vmem>>, %arg4: memref<32x32xbf16, #tpu.memory_space<vmem>>, %arg5: memref<1x32xf32, #tpu.memory_space<vmem>>, %arg6: memref<1x16x32xf32, #tpu.memory_space<vmem>>) attributes {dimension_semantics = [#tpu.dimension_semantics<parallel>], iteration_bounds = array<i64: 2>, scalar_prefetch = 0 : i64, scratch_operands = 0 : i64, tpu.core_type = #tpu.core_type<tc>, window_params = [{transform_indices = @transform_0, window_bounds = array<i64: 1, 16, 32>}, {pipeline_mode = #tpu.pipeline_mode<synchronous>, transform_indices = @transform_1, window_bounds = array<i64: 32, 96>}, {pipeline_mode = #tpu.pipeline_mode<synchronous>, transform_indices = @transform_2, window_bounds = array<i64: 1, 96>}, {pipeline_mode = #tpu.pipeline_mode<synchronous>, transform_indices = @transform_3, window_bounds = array<i64: 32, 32>}, {pipeline_mode = #tpu.pipeline_mode<synchronous>, transform_indices = @transform_4, window_bounds = array<i64: 1, 32>}, {transform_indices = @transform_5, window_bounds = array<i64: 1, 16, 32>}]} {
    %c0 = arith.constant 0 : index
    %c0_0 = arith.constant 0 : index
    %c0_1 = arith.constant 0 : index
    %0 = vector.load %arg1[%c0, %c0_0, %c0_1] : memref<1x16x32xf32, #tpu.memory_space<vmem>>, vector<1x16x32xf32>
    %1 = vector.shape_cast %0 : vector<1x16x32xf32> to vector<16x32xf32>
    %cst = arith.constant dense<0.000000e+00> : vector<16xf32>
    %2 = vector.multi_reduction <add>, %1, %cst [1] : vector<16x32xf32> to vector<16xf32>
    %3 = vector.shape_cast %2 : vector<16xf32> to vector<16x1xf32>
    %cst_2 = arith.constant 3.200000e+01 : f32
    %4 = vector.broadcast %cst_2 : f32 to vector<16x1xf32>
    %5 = arith.divf %3, %4 : vector<16x1xf32>
    %6 = vector.broadcast %5 : vector<16x1xf32> to vector<16x32xf32>
    %7 = arith.subf %1, %6 : vector<16x32xf32>
    %8 = arith.mulf %7, %7 : vector<16x32xf32>
    %cst_3 = arith.constant dense<0.000000e+00> : vector<16xf32>
    %9 = vector.multi_reduction <add>, %8, %cst_3 [1] : vector<16x32xf32> to vector<16xf32>
    %10 = vector.shape_cast %9 : vector<16xf32> to vector<16x1xf32>
    %cst_4 = arith.constant 3.200000e+01 : f32
    %11 = vector.broadcast %cst_4 : f32 to vector<16x1xf32>
    %12 = arith.divf %10, %11 : vector<16x1xf32>
    %cst_5 = arith.constant 9.99999997E-7 : f32
    %13 = vector.broadcast %cst_5 : f32 to vector<16x1xf32>
    %14 = arith.addf %12, %13 : vector<16x1xf32>
    %15 = math.rsqrt %14 : vector<16x1xf32>
    %16 = vector.broadcast %15 : vector<16x1xf32> to vector<16x32xf32>
    %17 = arith.mulf %7, %16 : vector<16x32xf32>
    %18 = arith.truncf %17 : vector<16x32xf32> to vector<16x32xbf16>
    %c0_6 = arith.constant 0 : index
    %c0_7 = arith.constant 0 : index
    %19 = vector.load %arg2[%c0_6, %c0_7] : memref<32x96xbf16, #tpu.memory_space<vmem>>, vector<32x96xbf16>
    %cst_8 = arith.constant dense<0.000000e+00> : vector<16x96xf32>
    %20 = tpu.matmul %18, %19, %cst_8 {dimension_numbers = #tpu.dot_dimension_numbers<[1], [0], [0], [1], [0, 0, 1, 1], [], []>} : vector<16x32xbf16>, vector<32x96xbf16>, vector<16x96xf32> -> vector<16x96xf32>
    %c0_9 = arith.constant 0 : index
    %c0_10 = arith.constant 0 : index
    %21 = vector.load %arg3[%c0_9, %c0_10] : memref<1x96xf32, #tpu.memory_space<vmem>>, vector<1x96xf32>
    %22 = vector.broadcast %21 : vector<1x96xf32> to vector<16x96xf32>
    %23 = arith.addf %20, %22 : vector<16x96xf32>
    %24 = vector.extract_strided_slice %23 {offsets = [0, 0], sizes = [16, 32], strides = [1, 1]} : vector<16x96xf32> to vector<16x32xf32>
    %25 = vector.extract_strided_slice %23 {offsets = [0, 32], sizes = [16, 32], strides = [1, 1]} : vector<16x96xf32> to vector<16x32xf32>
    %26 = vector.extract_strided_slice %23 {offsets = [0, 64], sizes = [16, 32], strides = [1, 1]} : vector<16x96xf32> to vector<16x32xf32>
    %cst_11 = arith.constant 0.000000e+00 : f32
    %27 = vector.broadcast %cst_11 : f32 to vector<16x32xf32>
    %28 = vector.extract_strided_slice %24 {offsets = [0, 0], sizes = [16, 8], strides = [1, 1]} : vector<16x32xf32> to vector<16x8xf32>
    %29 = arith.truncf %28 : vector<16x8xf32> to vector<16x8xbf16>
    %30 = vector.extract_strided_slice %25 {offsets = [0, 0], sizes = [16, 8], strides = [1, 1]} : vector<16x32xf32> to vector<16x8xf32>
    %31 = arith.truncf %30 : vector<16x8xf32> to vector<16x8xbf16>
    %32 = vector.extract_strided_slice %26 {offsets = [0, 0], sizes = [16, 8], strides = [1, 1]} : vector<16x32xf32> to vector<16x8xf32>
    %33 = arith.truncf %32 : vector<16x8xf32> to vector<16x8xbf16>
    %cst_12 = arith.constant dense<0.000000e+00> : vector<16x16xf32>
    %34 = tpu.matmul %29, %31, %cst_12 {dimension_numbers = #tpu.dot_dimension_numbers<[1], [1], [0], [0], [0, 0, 1, 0], [], []>} : vector<16x8xbf16>, vector<16x8xbf16>, vector<16x16xf32> -> vector<16x16xf32>
    %cst_13 = arith.constant 0.176776692 : f32
    %35 = vector.broadcast %cst_13 : f32 to vector<16x16xf32>
    %36 = arith.mulf %34, %35 : vector<16x16xf32>
    %cst_14 = arith.constant dense<0xFF800000> : vector<16xf32>
    %37 = vector.multi_reduction <maximumf>, %36, %cst_14 [1] : vector<16x16xf32> to vector<16xf32>
    %38 = vector.shape_cast %37 : vector<16xf32> to vector<16x1xf32>
    %39 = vector.broadcast %38 : vector<16x1xf32> to vector<16x16xf32>
    %40 = arith.subf %36, %39 : vector<16x16xf32>
    %41 = math.exp %40 : vector<16x16xf32>
    %cst_15 = arith.constant dense<0.000000e+00> : vector<16xf32>
    %42 = vector.multi_reduction <add>, %41, %cst_15 [1] : vector<16x16xf32> to vector<16xf32>
    %43 = vector.shape_cast %42 : vector<16xf32> to vector<16x1xf32>
    %44 = vector.broadcast %43 : vector<16x1xf32> to vector<16x16xf32>
    %45 = arith.divf %41, %44 : vector<16x16xf32>
    %46 = arith.truncf %45 : vector<16x16xf32> to vector<16x16xbf16>
    %cst_16 = arith.constant dense<0.000000e+00> : vector<16x8xf32>
    %47 = tpu.matmul %46, %33, %cst_16 {dimension_numbers = #tpu.dot_dimension_numbers<[1], [0], [0], [1], [0, 0, 1, 1], [], []>} : vector<16x16xbf16>, vector<16x8xbf16>, vector<16x8xf32> -> vector<16x8xf32>
    %48 = arith.truncf %47 : vector<16x8xf32> to vector<16x8xbf16>
    %c0_17 = arith.constant 0 : index
    %c0_18 = arith.constant 0 : index
    %49 = vector.load %arg4[%c0_17, %c0_18] : memref<32x32xbf16, #tpu.memory_space<vmem>>, vector<8x32xbf16>
    %cst_19 = arith.constant dense<0.000000e+00> : vector<16x32xf32>
    %50 = tpu.matmul %48, %49, %cst_19 {dimension_numbers = #tpu.dot_dimension_numbers<[1], [0], [0], [1], [0, 0, 1, 1], [], []>} : vector<16x8xbf16>, vector<8x32xbf16>, vector<16x32xf32> -> vector<16x32xf32>
    %51 = arith.addf %27, %50 : vector<16x32xf32>
    %52 = vector.extract_strided_slice %24 {offsets = [0, 8], sizes = [16, 8], strides = [1, 1]} : vector<16x32xf32> to vector<16x8xf32>
    %53 = arith.truncf %52 : vector<16x8xf32> to vector<16x8xbf16>
    %54 = vector.extract_strided_slice %25 {offsets = [0, 8], sizes = [16, 8], strides = [1, 1]} : vector<16x32xf32> to vector<16x8xf32>
    %55 = arith.truncf %54 : vector<16x8xf32> to vector<16x8xbf16>
    %56 = vector.extract_strided_slice %26 {offsets = [0, 8], sizes = [16, 8], strides = [1, 1]} : vector<16x32xf32> to vector<16x8xf32>
    %57 = arith.truncf %56 : vector<16x8xf32> to vector<16x8xbf16>
    %cst_20 = arith.constant dense<0.000000e+00> : vector<16x16xf32>
    %58 = tpu.matmul %53, %55, %cst_20 {dimension_numbers = #tpu.dot_dimension_numbers<[1], [1], [0], [0], [0, 0, 1, 0], [], []>} : vector<16x8xbf16>, vector<16x8xbf16>, vector<16x16xf32> -> vector<16x16xf32>
    %cst_21 = arith.constant 0.176776692 : f32
    %59 = vector.broadcast %cst_21 : f32 to vector<16x16xf32>
    %60 = arith.mulf %58, %59 : vector<16x16xf32>
    %cst_22 = arith.constant dense<0xFF800000> : vector<16xf32>
    %61 = vector.multi_reduction <maximumf>, %60, %cst_22 [1] : vector<16x16xf32> to vector<16xf32>
    %62 = vector.shape_cast %61 : vector<16xf32> to vector<16x1xf32>
    %63 = vector.broadcast %62 : vector<16x1xf32> to vector<16x16xf32>
    %64 = arith.subf %60, %63 : vector<16x16xf32>
    %65 = math.exp %64 : vector<16x16xf32>
    %cst_23 = arith.constant dense<0.000000e+00> : vector<16xf32>
    %66 = vector.multi_reduction <add>, %65, %cst_23 [1] : vector<16x16xf32> to vector<16xf32>
    %67 = vector.shape_cast %66 : vector<16xf32> to vector<16x1xf32>
    %68 = vector.broadcast %67 : vector<16x1xf32> to vector<16x16xf32>
    %69 = arith.divf %65, %68 : vector<16x16xf32>
    %70 = arith.truncf %69 : vector<16x16xf32> to vector<16x16xbf16>
    %cst_24 = arith.constant dense<0.000000e+00> : vector<16x8xf32>
    %71 = tpu.matmul %70, %57, %cst_24 {dimension_numbers = #tpu.dot_dimension_numbers<[1], [0], [0], [1], [0, 0, 1, 1], [], []>} : vector<16x16xbf16>, vector<16x8xbf16>, vector<16x8xf32> -> vector<16x8xf32>
    %72 = arith.truncf %71 : vector<16x8xf32> to vector<16x8xbf16>
    %c8 = arith.constant 8 : index
    %c0_25 = arith.constant 0 : index
    %73 = vector.load %arg4[%c8, %c0_25] : memref<32x32xbf16, #tpu.memory_space<vmem>>, vector<8x32xbf16>
    %cst_26 = arith.constant dense<0.000000e+00> : vector<16x32xf32>
    %74 = tpu.matmul %72, %73, %cst_26 {dimension_numbers = #tpu.dot_dimension_numbers<[1], [0], [0], [1], [0, 0, 1, 1], [], []>} : vector<16x8xbf16>, vector<8x32xbf16>, vector<16x32xf32> -> vector<16x32xf32>
    %75 = arith.addf %51, %74 : vector<16x32xf32>
    %76 = vector.extract_strided_slice %24 {offsets = [0, 16], sizes = [16, 8], strides = [1, 1]} : vector<16x32xf32> to vector<16x8xf32>
    %77 = arith.truncf %76 : vector<16x8xf32> to vector<16x8xbf16>
    %78 = vector.extract_strided_slice %25 {offsets = [0, 16], sizes = [16, 8], strides = [1, 1]} : vector<16x32xf32> to vector<16x8xf32>
    %79 = arith.truncf %78 : vector<16x8xf32> to vector<16x8xbf16>
    %80 = vector.extract_strided_slice %26 {offsets = [0, 16], sizes = [16, 8], strides = [1, 1]} : vector<16x32xf32> to vector<16x8xf32>
    %81 = arith.truncf %80 : vector<16x8xf32> to vector<16x8xbf16>
    %cst_27 = arith.constant dense<0.000000e+00> : vector<16x16xf32>
    %82 = tpu.matmul %77, %79, %cst_27 {dimension_numbers = #tpu.dot_dimension_numbers<[1], [1], [0], [0], [0, 0, 1, 0], [], []>} : vector<16x8xbf16>, vector<16x8xbf16>, vector<16x16xf32> -> vector<16x16xf32>
    %cst_28 = arith.constant 0.176776692 : f32
    %83 = vector.broadcast %cst_28 : f32 to vector<16x16xf32>
    %84 = arith.mulf %82, %83 : vector<16x16xf32>
    %cst_29 = arith.constant dense<0xFF800000> : vector<16xf32>
    %85 = vector.multi_reduction <maximumf>, %84, %cst_29 [1] : vector<16x16xf32> to vector<16xf32>
    %86 = vector.shape_cast %85 : vector<16xf32> to vector<16x1xf32>
    %87 = vector.broadcast %86 : vector<16x1xf32> to vector<16x16xf32>
    %88 = arith.subf %84, %87 : vector<16x16xf32>
    %89 = math.exp %88 : vector<16x16xf32>
    %cst_30 = arith.constant dense<0.000000e+00> : vector<16xf32>
    %90 = vector.multi_reduction <add>, %89, %cst_30 [1] : vector<16x16xf32> to vector<16xf32>
    %91 = vector.shape_cast %90 : vector<16xf32> to vector<16x1xf32>
    %92 = vector.broadcast %91 : vector<16x1xf32> to vector<16x16xf32>
    %93 = arith.divf %89, %92 : vector<16x16xf32>
    %94 = arith.truncf %93 : vector<16x16xf32> to vector<16x16xbf16>
    %cst_31 = arith.constant dense<0.000000e+00> : vector<16x8xf32>
    %95 = tpu.matmul %94, %81, %cst_31 {dimension_numbers = #tpu.dot_dimension_numbers<[1], [0], [0], [1], [0, 0, 1, 1], [], []>} : vector<16x16xbf16>, vector<16x8xbf16>, vector<16x8xf32> -> vector<16x8xf32>
    %96 = arith.truncf %95 : vector<16x8xf32> to vector<16x8xbf16>
    %c16 = arith.constant 16 : index
    %c0_32 = arith.constant 0 : index
    %97 = vector.load %arg4[%c16, %c0_32] : memref<32x32xbf16, #tpu.memory_space<vmem>>, vector<8x32xbf16>
    %cst_33 = arith.constant dense<0.000000e+00> : vector<16x32xf32>
    %98 = tpu.matmul %96, %97, %cst_33 {dimension_numbers = #tpu.dot_dimension_numbers<[1], [0], [0], [1], [0, 0, 1, 1], [], []>} : vector<16x8xbf16>, vector<8x32xbf16>, vector<16x32xf32> -> vector<16x32xf32>
    %99 = arith.addf %75, %98 : vector<16x32xf32>
    %100 = vector.extract_strided_slice %24 {offsets = [0, 24], sizes = [16, 8], strides = [1, 1]} : vector<16x32xf32> to vector<16x8xf32>
    %101 = arith.truncf %100 : vector<16x8xf32> to vector<16x8xbf16>
    %102 = vector.extract_strided_slice %25 {offsets = [0, 24], sizes = [16, 8], strides = [1, 1]} : vector<16x32xf32> to vector<16x8xf32>
    %103 = arith.truncf %102 : vector<16x8xf32> to vector<16x8xbf16>
    %104 = vector.extract_strided_slice %26 {offsets = [0, 24], sizes = [16, 8], strides = [1, 1]} : vector<16x32xf32> to vector<16x8xf32>
    %105 = arith.truncf %104 : vector<16x8xf32> to vector<16x8xbf16>
    %cst_34 = arith.constant dense<0.000000e+00> : vector<16x16xf32>
    %106 = tpu.matmul %101, %103, %cst_34 {dimension_numbers = #tpu.dot_dimension_numbers<[1], [1], [0], [0], [0, 0, 1, 0], [], []>} : vector<16x8xbf16>, vector<16x8xbf16>, vector<16x16xf32> -> vector<16x16xf32>
    %cst_35 = arith.constant 0.176776692 : f32
    %107 = vector.broadcast %cst_35 : f32 to vector<16x16xf32>
    %108 = arith.mulf %106, %107 : vector<16x16xf32>
    %cst_36 = arith.constant dense<0xFF800000> : vector<16xf32>
    %109 = vector.multi_reduction <maximumf>, %108, %cst_36 [1] : vector<16x16xf32> to vector<16xf32>
    %110 = vector.shape_cast %109 : vector<16xf32> to vector<16x1xf32>
    %111 = vector.broadcast %110 : vector<16x1xf32> to vector<16x16xf32>
    %112 = arith.subf %108, %111 : vector<16x16xf32>
    %113 = math.exp %112 : vector<16x16xf32>
    %cst_37 = arith.constant dense<0.000000e+00> : vector<16xf32>
    %114 = vector.multi_reduction <add>, %113, %cst_37 [1] : vector<16x16xf32> to vector<16xf32>
    %115 = vector.shape_cast %114 : vector<16xf32> to vector<16x1xf32>
    %116 = vector.broadcast %115 : vector<16x1xf32> to vector<16x16xf32>
    %117 = arith.divf %113, %116 : vector<16x16xf32>
    %118 = arith.truncf %117 : vector<16x16xf32> to vector<16x16xbf16>
    %cst_38 = arith.constant dense<0.000000e+00> : vector<16x8xf32>
    %119 = tpu.matmul %118, %105, %cst_38 {dimension_numbers = #tpu.dot_dimension_numbers<[1], [0], [0], [1], [0, 0, 1, 1], [], []>} : vector<16x16xbf16>, vector<16x8xbf16>, vector<16x8xf32> -> vector<16x8xf32>
    %120 = arith.truncf %119 : vector<16x8xf32> to vector<16x8xbf16>
    %c24 = arith.constant 24 : index
    %c0_39 = arith.constant 0 : index
    %121 = vector.load %arg4[%c24, %c0_39] : memref<32x32xbf16, #tpu.memory_space<vmem>>, vector<8x32xbf16>
    %cst_40 = arith.constant dense<0.000000e+00> : vector<16x32xf32>
    %122 = tpu.matmul %120, %121, %cst_40 {dimension_numbers = #tpu.dot_dimension_numbers<[1], [0], [0], [1], [0, 0, 1, 1], [], []>} : vector<16x8xbf16>, vector<8x32xbf16>, vector<16x32xf32> -> vector<16x32xf32>
    %123 = arith.addf %99, %122 : vector<16x32xf32>
    %124 = arith.addf %1, %123 : vector<16x32xf32>
    %c0_41 = arith.constant 0 : index
    %c0_42 = arith.constant 0 : index
    %125 = vector.load %arg5[%c0_41, %c0_42] : memref<1x32xf32, #tpu.memory_space<vmem>>, vector<1x32xf32>
    %126 = vector.broadcast %125 : vector<1x32xf32> to vector<16x32xf32>
    %127 = arith.addf %124, %126 : vector<16x32xf32>
    %c0_43 = arith.constant 0 : index
    %c0_44 = arith.constant 0 : index
    %c0_45 = arith.constant 0 : index
    %128 = vector.load %arg6[%c0_43, %c0_44, %c0_45] : memref<1x16x32xf32, #tpu.memory_space<vmem>>, vector<1x16x32xf32>
    %129 = vector.shape_cast %128 : vector<1x16x32xf32> to vector<16x32xf32>
    %130 = vector.shape_cast %127 : vector<16x32xf32> to vector<1x16x32xf32>
    tpu.vector_store %arg6[%c0_43, %c0_44, %c0_45], %130 {strides = array<i32>} : memref<1x16x32xf32, #tpu.memory_space<vmem>>, vector<1x16x32xf32>,
    return
  }
  func.func @transform_0(%arg0: i32) -> (i32, i32, i32) {
    %c0_i32 = arith.constant 0 : i32
    %c0_i32_0 = arith.constant 0 : i32
    %c0_i32_1 = arith.constant 0 : i32
    return %arg0, %c0_i32, %c0_i32_0 : i32, i32, i32
  }
  func.func @transform_1(%arg0: i32) -> (i32, i32) {
    %c0_i32 = arith.constant 0 : i32
    %c0_i32_0 = arith.constant 0 : i32
    %c0_i32_1 = arith.constant 0 : i32
    return %c0_i32, %c0_i32_0 : i32, i32
  }
  func.func @transform_2(%arg0: i32) -> (i32, i32) {
    %c0_i32 = arith.constant 0 : i32
    %c0_i32_0 = arith.constant 0 : i32
    %c0_i32_1 = arith.constant 0 : i32
    return %c0_i32, %c0_i32_0 : i32, i32
  }
  func.func @transform_3(%arg0: i32) -> (i32, i32) {
    %c0_i32 = arith.constant 0 : i32
    %c0_i32_0 = arith.constant 0 : i32
    %c0_i32_1 = arith.constant 0 : i32
    return %c0_i32, %c0_i32_0 : i32, i32
  }
  func.func @transform_4(%arg0: i32) -> (i32, i32) {
    %c0_i32 = arith.constant 0 : i32
    %c0_i32_0 = arith.constant 0 : i32
    %c0_i32_1 = arith.constant 0 : i32
    return %c0_i32, %c0_i32_0 : i32, i32
  }
  func.func @transform_5(%arg0: i32) -> (i32, i32, i32) {
    %c0_i32 = arith.constant 0 : i32
    %c0_i32_0 = arith.constant 0 : i32
    %c0_i32_1 = arith.constant 0 : i32
    return %arg0, %c0_i32, %c0_i32_0 : i32, i32, i32
  }
}

</mosaic_0001>

<bundles_post_ra>
// kernel: tpu_custom_call.1
= control target key start
LH: loop header
LB: loop body
LE: loop exit
PB: predicated region body
PF: predicated region fallthrough
CT: control target
= control target key end

     0   :  { %10 = vsyncpa [#allocation3], 0  ;;  %s2021_s0 = inlined_call_operand.hbm [shape: f32[2,16,32], index: 0, kind: input, shape index: {}]   ;;  %s2022_s1 = inlined_call_operand.hbm [shape: bf16[32,96], index: 1, kind: input, shape index: {}]   ;;  %s2023_s2 = inlined_call_operand.vmem [shape: f32[1,96], index: 2, kind: input, shape index: {}]   ;;  %s2024_s3 = inlined_call_operand.hbm [shape: bf16[32,32], index: 3, kind: input, shape index: {}]   ;;  %s2025_s4 = inlined_call_operand.vmem [shape: f32[1,32], index: 4, kind: input, shape index: {}]   ;;  %s2026_s5 = inlined_call_operand.hbm [shape: f32[2,16,32], index: 5, kind: output, shape index: {}]  }
   0x1   :  { %12 = vsyncpa [#allocation3 + $0x1], 0 }
   0x2   :  { %13 = vsyncpa [#allocation6], 0 }
   0x3   :  { %14 = vsyncpa [#allocation4], 0 }
   0x4   :  { %16 = vsyncpa [#allocation4 + $0x1], 0  ;;  %s1664_s18 = smov 0   ;;  %s1666_s19 = smov 0  }
   0x5   :  { %s1668_s20 = smov 0   ;;  %s1670_s21 = smov 0  }
   0x6 LB: > { %s1685_s22 = sadd.s32 4294967295, %s1609_s21   ;;  %s1185_s23 = sadd.s32 4294967294, %s1609_s21   ;;  %s1609_s21 = sphi %s1670_s21, %s2046_s21   ;;  %s1605_s20 = sphi %s1668_s20, %s2045_s20   ;;  %s1601_s19 = sphi %s1666_s19, %s2044_s19   ;;  %s1597_s18 = sphi %s1664_s18, %s2043_s18  }
   0x7   : > { %p42_p0 = scmp.ne.s32.totalorder %s1601_s19, %s1597_s18  ;;  %p2027_p1 = scmp.eq.s32.totalorder %s1685_s22, 0 }
   0x8   : > { %p156_p3 = scmp.eq.s32.totalorder %s1185_s23, 1  ;;  %p1186_p5 = scmp.ge.s32.totalorder %s1609_s21, 1 }
   0x9   : > { %p1694_p4 = por %p2027_p1, %p42_p0  ;;  %p163_p7 = scmp.lt.s32.totalorder %s1609_s21, 3 }
   0xa   : > { %p1699_p6 = por %p156_p3, %p42_p0  ;;  %s1611_s27 = smov [#allocation5]  }
   0xb   : > { %s2030_s24 = scalar_select %p1694_p4, 1, 0 }
   0xc   : > { %s2031_s25 = scalar_select %p1699_p6, 1, 0 }
   0xd   : > { %p1704_p8 = pnand %p1186_p5, %p163_p7  ;;  %s175_s28 = sshll.u32 %s1611_s27, 4  ;;  %s1708_s28 = int_to_ptr.vmem [resolvable:$true] %s175_s28 }
   0xe   : > { %s1612_s30 = smov [#allocation7]   ;;  %s1453_s9 = scalar_lea.hbm %s2022_s1, 256 }
   0xf   : > { %p1341_p9 = pneg %p1704_p8  ;;  %s191_s6 = sshll.u32 %s1612_s30, 4  ;;  %s1719_s6 = int_to_ptr.vmem [resolvable:$true] %s191_s6 }
  0x10   : > { %p1454_p12 = scmp.ne.s32.totalorder %s2022_s1, %s1453_s9  ;;  %p1460_p5 = scmp.lt.u32.totalorder %s1453_s9, %s2022_s1 }
  0x11   : > { %p1715_p11 = pnand %p1341_p9, %p2027_p1 }
  0x13   : > { %p1455_p13 = pneg %p1715_p11 }
  0x15   : > { %p1456_p0 = pnand %p1455_p13, %p1454_p12 }
  0x17   : > { %p1457_p3 = pneg %p1456_p0 }
  0x19   : > { %p1462_p7 = pnand %p1460_p5, %p1457_p3 }
  0x1b   : > { %1465 = shalt.err (!%p1462_p7)
}
  0x1c   : > { %s1466_s14 = scalar_lea.vmem %s1708_s28, 256  ;;  %p1474_p2 = scmp.lt.s32.totalorder %s1708_s28, %s1708_s28 }
  0x1d   : > { %p1467_p9 = scmp.ne.s32.totalorder %s1708_s28, %s1466_s14  ;;  %p1475_p12 = scmp.lt.s32.totalorder %s1466_s14, %s1466_s14 }
  0x1f   : > { %p1469_p10 = pnand %p1467_p9, %p1455_p13  ;;  %p1476_p0 = por %p1475_p12, %p1474_p2 }
  0x21   : > { %p1470_p1 = pneg %p1469_p10 }
  0x23   : > { %p1477_p6 = pnand %p1476_p0, %p1470_p1 }
  0x25   : > { %1480 = shalt.err (!%p1477_p6)
}
  0x26   : > { %s1613_s15 = smov 64   ;;  %s1614_s16 = smov 4  }
  0x27   : > { %1344 = dma.hbm_to_vmem [thread:$0]  (!%p1715_p11), %s2022_s1, 256, %s1708_s28, [#allocation6], %s1613_s15, %s1613_s15, %s1614_s16  }
  0x28   : > { %s1481_s7 = scalar_lea.hbm %s2024_s3, 256 }
  0x29   : > { %p1482_p2 = scmp.ne.s32.totalorder %s2024_s3, %s1481_s7  ;;  %p1488_p10 = scmp.lt.u32.totalorder %s1481_s7, %s2024_s3 }
  0x2b   : > { %p1484_p1 = pnand %p1482_p2, %p1455_p13 }
  0x2d   : > { %p1485_p6 = pneg %p1484_p1 }
  0x2f   : > { %p1490_p3 = pnand %p1488_p10, %p1485_p6 }
  0x31   : > { %1493 = shalt.err (!%p1490_p3)
}
  0x32   : > { %s1494_s28 = scalar_lea.vmem %s1719_s6, 256  ;;  %p1502_p12 = scmp.lt.s32.totalorder %s1719_s6, %s1719_s6 }
  0x33   : > { %p1495_p5 = scmp.ne.s32.totalorder %s1719_s6, %s1494_s28  ;;  %p1503_p0 = scmp.lt.s32.totalorder %s1494_s28, %s1494_s28 }
  0x35   : > { %p1497_p7 = pnand %p1495_p5, %p1455_p13  ;;  %p1504_p2 = por %p1503_p0, %p1502_p12 }
  0x37   : > { %p1498_p9 = pneg %p1497_p7 }
  0x39   : > { %p1505_p1 = pnand %p1504_p2, %p1498_p9 }
  0x3b   : > { %1508 = shalt.err (!%p1505_p1)
}
  0x3c   : > { %1347 = dma.hbm_to_vmem [thread:$0]  (!%p1715_p11), %s2024_s3, 256, %s1719_s6, [#allocation6], %s1613_s15, %s1613_s15, %s1614_s16  }
  0x3d   : > { %s1774_s14 = sadd.s32 1, %s1609_s21   ;;  %s29_s29 = sadd.s32 1, %s1605_s20 }
  0x3e   : > { %s26_s17 = ssub.s32 %s1609_s21, %s1774_s14  ;;  %p36_p13 = scmp.ne.s32.totalorder %s1605_s20, %s1601_s19 }
  0x3f   : > { %p27_p6 = scmp.eq.s32.totalorder %s26_s17, 0  ;;  %p37_p10 = scmp.eq.s32.totalorder %s1609_s21, 0 }
  0x40   : > { %p2034_p3 = scmp.eq.s32.totalorder %s1685_s22, 1  ;;  %p1358_p7 = scmp.lt.s32.totalorder %s1609_s21, 2 }
  0x41   : > { %s1790_s27 = scalar_select %p27_p6, %s1605_s20, %s29_s29  }
  0x42   : > { %p1784_p5 = por %p2034_p3, %p36_p13  ;;  %p38_p9 = por %p37_p10, %p36_p13 }
  0x43   : > { %s208_s30 = sand.u32 1, %s1605_s20   ;;  %s1220_s6 = sshll.u32 %s1609_s21, 8 }
  0x44   : > { %s2035_s23 = scalar_select %p1784_p5, 1, 0 }
  0x45   : > { %s1190_s7 = sshll.u32 %s208_s30, 4  ;;  %s1797_s8 = scalar_lea.hbm %s2021_s0, %s1220_s6 }
  0x46   : > { %s212_s9 = scalar_lea.vmem [#allocation2], %s1190_s7  ;;  %p1801_p11 = pnand %p1358_p7, %p38_p9 }
  0x47   : > { %s219_s10 = sshll.u32 %s212_s9, 4  ;;  %s1805_s28 = scalar_lea.sflag [#allocation3], %s208_s30  ;;  %s1799_s10 = int_to_ptr.vmem [resolvable:$true] %s219_s10 }
  0x48   : > { %s1509_s12 = scalar_lea.hbm %s1797_s8, 256  ;;  %p1511_p0 = pneg %p1801_p11 }
  0x49   : > { %p1510_p12 = scmp.ne.s32.totalorder %s1797_s8, %s1509_s12  ;;  %s1514_s17 = scalar_lea.hbm %s2021_s0, 512 }
  0x4a   : > { %p1515_p13 = scmp.lt.u32.totalorder %s1797_s8, %s2021_s0  ;;  %p1516_p6 = scmp.lt.u32.totalorder %s1514_s17, %s1509_s12 }
  0x4b   : > { %p1512_p2 = pnand %p1511_p0, %p1510_p12  ;;  %p1518_p3 = scmp.lt.u32.totalorder %s1509_s12, %s1797_s8 }
  0x4c   : > { %p1517_p10 = por %p1516_p6, %p1515_p13 }
  0x4d   : > { %p1513_p1 = pneg %p1512_p2 }
  0x4e   : > { %p1519_p7 = por %p1518_p3, %p1517_p10 }
  0x50   : > { %p1520_p9 = pnand %p1519_p7, %p1513_p1 }
  0x52   : > { %1523 = shalt.err (!%p1520_p9)
}
  0x53   : > { %s1524_s30 = scalar_lea.vmem %s1799_s10, 256  ;;  %s1615_s15 = smov [#allocation2]  }
  0x54   : > { %p1525_p12 = scmp.ne.s32.totalorder %s1799_s10, %s1524_s30  ;;  %s1529_s16 = sshll.u32 %s1615_s15, 4  ;;  %s1530_s16 = int_to_ptr.vmem [resolvable:$false] %s1529_s16 }
  0x55   : > { %s1531_s9 = scalar_lea.vmem %s1530_s16, 512  ;;  %p1532_p4 = scmp.lt.s32.totalorder %s1799_s10, %s1530_s16 }
  0x56   : > { %p1527_p2 = pnand %p1525_p12, %p1511_p0  ;;  %p1533_p13 = scmp.lt.s32.totalorder %s1531_s9, %s1524_s30 }
  0x58   : > { %p1528_p5 = pneg %p1527_p2  ;;  %p1534_p6 = por %p1533_p13, %p1532_p4 }
  0x5a   : > { %p1535_p10 = pnand %p1534_p6, %p1528_p5 }
  0x5c   : > { %1538 = shalt.err (!%p1535_p10)
}
  0x5d   : > { %s1616_s12 = smov 128   ;;  %s1617_s13 = smov 8  }
  0x5e   : > { %1351 = dma.hbm_to_vmem [thread:$0]  (!%p1801_p11), %s1797_s8, 256, %s1799_s10, %s1805_s28, %s1616_s12, %s1616_s12, %s1617_s13  }
  0x5f   : > { %231 = sbr.rel (%p1704_p8) target bundleno = 3054 (0xbee), region = 40  ;;  %s1836_s29 = sand.u32 (!%p1704_p8), 1, %s1601_s19  }
  0x60   : > { %s1194_s17 = sshll.u32 (!%p1704_p8), %s1836_s29, 4  ;;  %s234_s7 = scalar_lea.sflag (!%p1704_p8), [#allocation3], %s1836_s29 }
  0x61   : > { %s237_s6 = scalar_lea.vmem (!%p1704_p8), [#allocation2], %s1194_s17  ;;  %p2037_p4 = scmp.ne.s32.totalorder (!%p1704_p8), %s2030_s24, 0 }
  0x66   : > { %1584 = dma.done.wait (%p2037_p4), %s234_s7, 256  }
  0x67   : > { %1586 = vsyncadd (%p2037_p4), %s234_s7, 4294967040  ;;  %p2038_p5 = scmp.eq.s32.totalorder %s1685_s22, 0 }
  0x69   : > { %1588 = dma.done.wait (%p2038_p5), [#allocation6], 512   ;;  %p2039_p8 = pmov %p2038_p5 }
  0x6a   : > { %vm275_vm0 = vcmask 261120   ;;  %v1850_v0 = vld [vmem:[%s237_s6] sm:$0xff]  ;;  %v1852_v1 = vld [vmem:[%s237_s6 + $0x8] sm:$0xff]  ;;  %v1618_v15 = vmov 0.0   ;;  %vm1619_vm1 = vmmov 0   ;;  %s1620_s8 = smov 88  }
  0x6b   : > { %1590 = vsyncadd (%p2039_p8), [#allocation6], 4294966784  ;;  %v276_v2 = vsel %vm275_vm0, %v1850_v0, 0.0  ;;  %v279_v3 = vsel %vm275_vm0, %v1852_v1, 0.0  ;;  %v1415_v14 = vld [vmem:[#allocation5] sm:$0xff]   ;;  %1249 = vmatprep.subr.bf16.mxu0 %v1618_v15  ;;  %1253 = vmatprep.mubr.msk.bf16.mxu0 %vm1619_vm1, %v1618_v15  ;;  %v1416_v16 = vld [vmem:[#allocation5 + $0x8] sm:$0xff]  }
  0x6c   : > { %277 = vadd.xlane.f32.xlu0 %v276_v2  ;;  %1250 = vmatpush3.bf16.msra.mxu0 %v1415_v14  ;;  %v1198_v28 = vld [vmem:[%s2023_s2] ss:$0 sm:$0xff]  ;;  %s1621_s10 = smov 96   ;;  %s1622_s11 = smov 120   ;;  %vm375_vm2 = vcmask 64512   ;;  %vm425_vm3 = vcmask 130048  }
  0x6d   : > { %1257 = vmatprep.subr.bf16.mxu1 %v1618_v15  ;;  %1251 = vmatprep.subr.bf16.mxu0 %v1618_v15  ;;  %s1623_s28 = smov 64   ;;  %s1624_s30 = smov 80   ;;  %vm626_vm4 = vcmask 1043456  }
  0x6e   : > { %1259 = vmatprep.mubr.msk.bf16.mxu1 %vm1619_vm1, %v1618_v15  ;;  %s1625_s15 = smov 112   ;;  %s1626_s16 = smov 56  }
  0x6f   : > { %s1627_s9 = smov 48   ;;  %s1628_s12 = smov 104  }
  0x70   : > { %280 = vadd.xlane.f32.xlu0 %v279_v3  ;;  %1252 = vmatpush3.bf16.msra.mxu0 %v1416_v16  ;;  %s1629_s13 = smov 72   ;;  %s1630_s7 = smov 40  }
  0x71   : > { %1263 = vmatprep.subr.bf16.mxu0 %v1618_v15  ;;  %s1221_s26 = sshll.u32 %s1685_s22, 8  ;;  %s1080_s22 = scalar_lea.sflag [#allocation4], %s1836_s29 }
  0x72   : > { %p2040_p0 = scmp.ne.s32.totalorder %s2035_s23, 0 }
  0xf9   : > { %v278_v4 = vpop.xlane.xlu0 %277 }
  0xfa   : > { %v283_v5 = vmul.f32 0.03125, %v278_v4 }
  0xfc   : > { %v285_v6 = vsub.f32 %v1850_v0, %v283_v5 }
  0xfd   : > { %v281_v7 = vpop.xlane.xlu0 %280 }
  0xfe   : > { %v284_v8 = vmul.f32 0.03125, %v281_v7  ;;  %v287_v9 = vmul.f32 %v285_v6, %v285_v6 }
 0x100   : > { %v286_v10 = vsub.f32 %v1852_v1, %v284_v8  ;;  %v289_v11 = vsel %vm275_vm0, %v287_v9, 0.0 }
 0x101   : > { %290 = vadd.xlane.f32.xlu1 %v289_v11 }
 0x102   : > { %v288_v12 = vmul.f32 %v286_v10, %v286_v10 }
 0x104   : > { %v292_v13 = vsel %vm275_vm0, %v288_v12, 0.0 }
 0x105   : > { %293 = vadd.xlane.f32.xlu1 %v292_v13 }
 0x18e   : > { %v291_v17 = vpop.xlane.xlu1 %290 }
 0x18f   : > { %v295_v18 = vmul.f32 0.03125, %v291_v17 }
 0x191   : > { %v297_v19 = vadd.f32 1e-06, %v295_v18 }
 0x192   : > { %v294_v20 = vpop.xlane.xlu1 %293 }
 0x193   : > { %v296_v21 = vmul.f32 0.03125, %v294_v20  ;;  %1417 = vrsqrt.f32 %v297_v19 }
 0x195   : > { %v298_v22 = vadd.f32 1e-06, %v296_v21 }
 0x197   : > { %1419 = vrsqrt.f32 %v298_v22 }
 0x19d   : > { %v1418_v23 = vpop.eup %1417 }
 0x19e   : > { %v301_v25 = vmul.f32 %v1418_v23, %v285_v6 }
 0x1a1   : > { %v1420_v24 = vpop.eup %1419 }
 0x1a2   : > { %v302_v26 = vmul.f32 %v1420_v24, %v286_v10 }
 0x1a4   : > { %v303_v27 = vpack.c.bf16 %v302_v26, %v301_v25 }
 0x1a6   : > { %1254 = vmatmul.mubr.msk.bf16.vlgmr.msra.gmra.mrb[0].mxu0 %vm275_vm0, %v303_v27 }
 0x1a7   : > { %1265 = vmatprep.mubr.msk.bf16.mxu0 %vm1619_vm1, %v1618_v15 }
 0x279   : > { %v364_v29 = vpop.f32.mrb[0].mxu0 }
 0x27a   : > { %v1255_v30 = vpop.f32.mrb[1].mxu0  ;;  %v365_v32 = vadd.f32 %v1198_v28, %v364_v29 }
 0x27b   : > { %v367_v31 = vpop.f32.mrb[2].mxu0 }
 0x27c   : > { %v368_v33 = vadd.f32 %v1198_v28, %v367_v31  ;;  %v1256_v34 = vpop.f32.mrb[3].mxu0 }
 0x27d   : > { %v622_v34 = vld [vmem:[#allocation7 + $0x4] sm:$0xf] }
 0x27e   : > { %v1876_v35 = vpack.c.bf16 %v368_v33, %v365_v32  ;;  %v497_v32 = vld [vmem:[#allocation7] sm:$0xf] }
 0x27f   : > { %v675_v33 = vsel %vm626_vm4, %v497_v32, 0 }
 0x280   : > { %500 = vrot.lane.b32.xlu1 %v1876_v35, %s1620_s8  ;;  %373 = vrot.lane.b32.xlu0 %v1876_v35, %s1621_s10  ;;  %s271_s8 = scalar_lea.vmem [#allocation8], %s1194_s17 }
 0x281   : > { %s1093_s10 = sshll.u32 %s271_s8, 4  ;;  %s1975_s10 = int_to_ptr.vmem [resolvable:$true] %s1093_s10 }
 0x282   : > { %s1539_s17 = scalar_lea.vmem %s1975_s10, 256 }
 0x283   : > { %p1540_p11 = scmp.ne.s32.totalorder %s1975_s10, %s1539_s17 }
 0x284   : > { %498 = vrot.lane.b32.xlu1 %v1876_v35, %s1622_s11 }
 0x285   : > { %p1541_p1 = pnand %p1540_p11, %p2040_p0 }
 0x287   : > { %p1542_p3 = pneg %p1541_p1 }
 0x2f2   : > { %v374_v36 = vpop.permute.xlu0 %373  ;;  %v501_v38 = vpop.permute.xlu1 %500 }
 0x2f3   : > { %v380_v37 = vsel %vm375_vm2, %v374_v36, 0  ;;  %v506_v39 = vsel %vm375_vm2, %v501_v38, 0  ;;  %v628_v36 = vsel %vm626_vm4, %v622_v34, 0 }
 0x2f4   : > { %1258 = vmatpush3.bf16.xpose.msra.mxu1 %v380_v37 }
 0x2f5   : > { %1269 = vmatprep.subr.bf16.mxu1 %v1618_v15 }
 0x2f6   : > { %v499_v40 = vpop.permute.xlu1 %498 }
 0x2fb   : > { %1260 = vmatmul.mubr.msk.bf16.vlgmr.msra.gmra.mrb[0].mxu1 %vm375_vm2, %v1876_v35 }
 0x2fc   : > { %1270 = vmatpush3.bf16.xpose.msra.mxu1 %v506_v39  ;;  %1271 = vmatprep.mubr.msk.bf16.mxu1 %vm1619_vm1, %v1618_v15 }
 0x2fd   : > { %1281 = vmatprep.subr.bf16.mxu1 %v1618_v15 }
 0x303   : > { %1272 = vmatmul.mubr.msk.bf16.vlgmr.msra.gmra.mrb[4].mxu1 %vm375_vm2, %v499_v40 }
 0x304   : > { %1283 = vmatprep.mubr.msk.bf16.mxu1 %vm1619_vm1, %v1618_v15  ;;  %1282 = vmatpush3.bf16.msra.mxu1 %v628_v36 }
 0x305   : > { %1293 = vmatprep.subr.bf16.mxu1 %v1618_v15 }
 0x3ce   : > { %v416_v41 = vpop.f32.mrb[0].mxu1 }
 0x3cf   : > { %v423_v42 = vmul.f32 0.17677669, %v416_v41  ;;  %v1261_v43 = vpop.f32.mrb[1].mxu1 }
 0x3d0   : > { %v419_v44 = vpop.f32.mrb[2].mxu1 }
 0x3d1   : > { %v424_v45 = vmul.f32 0.17677669, %v419_v44  ;;  %v1262_v46 = vpop.f32.mrb[3].mxu1  ;;  %v426_v47 = vsel %vm425_vm3, %v423_v42, -inf }
 0x3d2   : > { %427 = vmax.xlane.f32.xlu1 %v426_v47 }
 0x3d3   : > { %v429_v48 = vsel %vm425_vm3, %v424_v45, -inf }
 0x3d4   : > { %430 = vmax.xlane.f32.xlu0 %v429_v48 }
 0x3d6   : > { %v542_v49 = vpop.f32.mrb[4].mxu1 }
 0x3d7   : > { %v549_v50 = vmul.f32 0.17677669, %v542_v49  ;;  %v1273_v51 = vpop.f32.mrb[5].mxu1 }
 0x3d8   : > { %v545_v52 = vpop.f32.mrb[6].mxu1 }
 0x3d9   : > { %v550_v53 = vmul.f32 0.17677669, %v545_v52  ;;  %v1274_v54 = vpop.f32.mrb[7].mxu1  ;;  %v551_v55 = vsel %vm425_vm3, %v549_v50, -inf }
 0x3da   : > { %552 = vmax.xlane.f32.xlu0 %v551_v55 }
 0x3db   : > { %v554_v56 = vsel %vm425_vm3, %v550_v53, -inf }
 0x3de   : > { %555 = vmax.xlane.f32.xlu0 %v554_v56 }
 0x45f   : > { %v428_v57 = vpop.xlane.xlu1 %427 }
 0x460   : > { %v432_v58 = vsub.f32 %v423_v42, %v428_v57 }
 0x461   : > { %v431_v59 = vpop.xlane.xlu0 %430 }
 0x462   : > { %v434_v60 = vmul.f32 1.442695, %v432_v58  ;;  %v433_v61 = vsub.f32 %v424_v45, %v431_v59 }
 0x464   : > { %1421 = vpow2.f32 %v434_v60  ;;  %v436_v62 = vmul.f32 1.442695, %v433_v61 }
 0x466   : > { %1423 = vpow2.f32 %v436_v62 }
 0x467   : > { %v553_v63 = vpop.xlane.xlu0 %552 }
 0x468   : > { %v557_v2 = vsub.f32 %v549_v50, %v553_v63 }
 0x46a   : > { %v559_v3 = vmul.f32 1.442695, %v557_v2 }
 0x46b   : > { %v556_v4 = vpop.xlane.xlu0 %555 }
 0x46c   : > { %1425 = vpow2.f32 %v559_v3  ;;  %v558_v5 = vsub.f32 %v550_v53, %v556_v4 }
 0x46e   : > { %v1422_v6 = vpop.eup %1421  ;;  %v561_v7 = vmul.f32 1.442695, %v558_v5 }
 0x46f   : > { %v438_v8 = vsel %vm425_vm3, %v1422_v6, 0.0 }
 0x470   : > { %v1424_v9 = vpop.eup %1423  ;;  %1427 = vpow2.f32 %v561_v7  ;;  %439 = vadd.xlane.f32.xlu1 %v438_v8 }
 0x471   : > { %v441_v10 = vsel %vm425_vm3, %v1424_v9, 0.0 }
 0x472   : > { %442 = vadd.xlane.f32.xlu0 %v441_v10 }
 0x476   : > { %v1426_v11 = vpop.eup %1425 }
 0x477   : > { %v563_v12 = vsel %vm425_vm3, %v1426_v11, 0.0 }
 0x478   : > { %564 = vadd.xlane.f32.xlu1 %v563_v12 }
 0x47a   : > { %v1428_v13 = vpop.eup %1427 }
 0x47b   : > { %v566_v14 = vsel %vm425_vm3, %v1428_v13, 0.0 }
 0x47c   : > { %567 = vadd.xlane.f32.xlu0 %v566_v14 }
 0x489   : > { %449 = vrot.lane.b32.xlu1 %v1876_v35, %s1623_s28 }
 0x48d   : > { %720 = vrot.lane.b32.xlu1 %v1876_v35, %s1624_s30  ;;  %s1973_s30 = scalar_lea.hbm %s2026_s5, %s1221_s26 }
 0x491   : > { %718 = vrot.lane.b32.xlu1 %v1876_v35, %s1625_s15  ;;  %s1631_s15 = smov [#allocation8]  }
 0x492   : > { %574 = vrot.lane.b32.xlu0 %v1876_v35, %s1626_s16  ;;  %s1543_s16 = sshll.u32 %s1631_s15, 4  ;;  %s1544_s16 = int_to_ptr.vmem [resolvable:$false] %s1543_s16 }
 0x493   : > { %p1546_p7 = scmp.lt.s32.totalorder %s1975_s10, %s1544_s16 }
 0x4fd   : > { %v440_v16 = vpop.xlane.xlu1 %439 }
 0x4fe   : > { %1429 = vrcp.f32 %v440_v16 }
 0x4ff   : > { %v443_v17 = vpop.xlane.xlu0 %442 }
 0x500   : > { %1431 = vrcp.f32 %v443_v17 }
 0x505   : > { %v565_v18 = vpop.xlane.xlu1 %564 }
 0x506   : > { %1433 = vrcp.f32 %v565_v18 }
 0x508   : > { %v1430_v19 = vpop.eup %1429 }
 0x509   : > { %v450_v20 = vpop.permute.xlu1 %449  ;;  %v568_v21 = vpop.xlane.xlu0 %567  ;;  %v445_v23 = vmul.f32 %v1430_v19, %v1422_v6 }
 0x50a   : > { %v1432_v22 = vpop.eup %1431  ;;  %1435 = vrcp.f32 %v568_v21  ;;  %1264 = vmatpush3.bf16.msra.mxu0 %v450_v20 }
 0x50b   : > { %v447_v24 = vmul.f32 %v1432_v22, %v1424_v9  ;;  %1275 = vmatprep.subr.bf16.mxu0 %v1618_v15 }
 0x50d   : > { %v575_v25 = vpop.permute.xlu0 %574  ;;  %v448_v26 = vpack.c.bf16 %v447_v24, %v445_v23  ;;  %v721_v44 = vpop.permute.xlu1 %720 }
 0x50e   : > { %v726_v48 = vsel %vm375_vm2, %v721_v44, 0 }
 0x50f   : > { %1266 = vmatmul.mubr.msk.bf16.vlgmr.msra.gmra.mrb[4].mxu0 %vm425_vm3, %v448_v26 }
 0x510   : > { %1276 = vmatpush3.bf16.msra.mxu0 %v575_v25  ;;  %1277 = vmatprep.mubr.msk.bf16.mxu0 %vm1619_vm1, %v1618_v15  ;;  %v1434_v27 = vpop.eup %1433 }
 0x511   : > { %1287 = vmatprep.subr.bf16.mxu0 %v1618_v15  ;;  %v570_v29 = vmul.f32 %v1434_v27, %v1426_v11  ;;  %v719_v49 = vpop.permute.xlu1 %718 }
 0x514   : > { %v1436_v28 = vpop.eup %1435 }
 0x515   : > { %v572_v30 = vmul.f32 %v1436_v28, %v1428_v13  ;;  %v842_v28 = vld [vmem:[#allocation7 + $0x8] sm:$0xf] }
 0x517   : > { %v573_v31 = vpack.c.bf16 %v572_v30, %v570_v29  ;;  %v847_v29 = vsel %vm626_vm4, %v842_v28, 0 }
 0x519   : > { %1278 = vmatmul.mubr.msk.bf16.vlgmr.msra.gmra.mrb[8].mxu0 %vm425_vm3, %v573_v31 }
 0x51a   : > { %1289 = vmatprep.mubr.msk.bf16.mxu0 %vm1619_vm1, %v1618_v15  ;;  %1288 = vmatpush3.bf16.msra.mxu0 %v675_v33 }
 0x51b   : > { %1299 = vmatprep.subr.bf16.mxu0 %v1618_v15 }
 0x5e2   : > { %v489_v37 = vpop.f32.mrb[4].mxu0 }
 0x5e3   : > { %v1267_v38 = vpop.f32.mrb[5].mxu0 }
 0x5e4   : > { %v492_v39 = vpop.f32.mrb[6].mxu0 }
 0x5e5   : > { %v496_v40 = vpack.c.bf16 %v492_v39, %v489_v37  ;;  %v1268_v41 = vpop.f32.mrb[7].mxu0 }
 0x5e7   : > { %1290 = vmatmul.mubr.msk.bf16.vlgmr.msra.gmra.mrb[12].mxu0 %vm375_vm2, %v496_v40 }
 0x5e8   : > { %1301 = vmatprep.mubr.msk.bf16.mxu0 %vm1619_vm1, %v1618_v15 }
 0x5ec   : > { %v614_v42 = vpop.f32.mrb[8].mxu0 }
 0x5ed   : > { %v1279_v43 = vpop.f32.mrb[9].mxu0 }
 0x5ee   : > { %v617_v45 = vpop.f32.mrb[10].mxu0 }
 0x5ef   : > { %v621_v46 = vpack.c.bf16 %v617_v45, %v614_v42  ;;  %v1280_v47 = vpop.f32.mrb[11].mxu0 }
 0x5f1   : > { %1284 = vmatmul.mubr.msk.bf16.vlgmr.msra.gmra.mrb[8].mxu1 %vm375_vm2, %v621_v46 }
 0x5f2   : > { %1294 = vmatpush3.bf16.xpose.msra.mxu1 %v726_v48  ;;  %1295 = vmatprep.mubr.msk.bf16.mxu1 %vm1619_vm1, %v1618_v15 }
 0x5f3   : > { %1305 = vmatprep.subr.bf16.mxu1 %v1618_v15 }
 0x5f9   : > { %1296 = vmatmul.mubr.msk.bf16.vlgmr.msra.gmra.mrb[12].mxu1 %vm375_vm2, %v719_v49 }
 0x5fa   : > { %1307 = vmatprep.mubr.msk.bf16.mxu1 %vm1619_vm1, %v1618_v15  ;;  %1306 = vmatpush3.bf16.msra.mxu1 %v847_v29 }
 0x5fb   : > { %1317 = vmatprep.subr.bf16.mxu1 %v1618_v15 }
 0x6ba   : > { %v711_v50 = vpop.f32.mrb[12].mxu0 }
 0x6bb   : > { %v1291_v51 = vpop.f32.mrb[13].mxu0 }
 0x6bc   : > { %v714_v52 = vpop.f32.mrb[14].mxu0 }
 0x6bd   : > { %v1292_v53 = vpop.f32.mrb[15].mxu0 }
 0x6be   : > { %v1016_v53 = vld [vmem:[#allocation7 + $0xc] sm:$0xf] }
 0x6c4   : > { %v664_v54 = vpop.f32.mrb[8].mxu1 }
 0x6c5   : > { %v1927_v55 = vadd.f32 %v711_v50, %v664_v54  ;;  %v1285_v56 = vpop.f32.mrb[9].mxu1  ;;  %v1021_v54 = vsel %vm626_vm4, %v1016_v53, 0 }
 0x6c6   : > { %v667_v57 = vpop.f32.mrb[10].mxu1 }
 0x6c7   : > { %v1929_v58 = vadd.f32 %v714_v52, %v667_v57  ;;  %v1286_v59 = vpop.f32.mrb[11].mxu1 }
 0x6cc   : > { %v762_v60 = vpop.f32.mrb[12].mxu1 }
 0x6cd   : > { %v769_v61 = vmul.f32 0.17677669, %v762_v60  ;;  %v1297_v62 = vpop.f32.mrb[13].mxu1 }
 0x6ce   : > { %v765_v63 = vpop.f32.mrb[14].mxu1 }
 0x6cf   : > { %v770_v2 = vmul.f32 0.17677669, %v765_v63  ;;  %v1298_v3 = vpop.f32.mrb[15].mxu1  ;;  %v771_v4 = vsel %vm425_vm3, %v769_v61, -inf }
 0x6d0   : > { %772 = vmax.xlane.f32.xlu1 %v771_v4 }
 0x6d1   : > { %v774_v5 = vsel %vm425_vm3, %v770_v2, -inf }
 0x6d2   : > { %775 = vmax.xlane.f32.xlu0 %v774_v5 }
 0x6e1   : > { %794 = vrot.lane.b32.xlu1 %v1876_v35, %s1627_s9  ;;  %s1545_s9 = scalar_lea.vmem %s1544_s16, 512 }
 0x6e2   : > { %p1547_p9 = scmp.lt.s32.totalorder %s1545_s9, %s1539_s17 }
 0x6e4   : > { %p1548_p12 = por %p1547_p9, %p1546_p7 }
 0x6e5   : > { %892 = vrot.lane.b32.xlu1 %v1876_v35, %s1628_s12 }
 0x6e6   : > { %p1549_p2 = pnand %p1548_p12, %p1542_p3 }
 0x75d   : > { %v773_v6 = vpop.xlane.xlu1 %772 }
 0x75e   : > { %v777_v7 = vsub.f32 %v769_v61, %v773_v6 }
 0x75f   : > { %v776_v8 = vpop.xlane.xlu0 %775 }
 0x760   : > { %v779_v9 = vmul.f32 1.442695, %v777_v7  ;;  %v778_v10 = vsub.f32 %v770_v2, %v776_v8 }
 0x761   : > { %v795_v11 = vpop.permute.xlu1 %794 }
 0x762   : > { %1437 = vpow2.f32 %v779_v9  ;;  %v781_v12 = vmul.f32 1.442695, %v778_v10  ;;  %1300 = vmatpush3.bf16.msra.mxu0 %v795_v11 }
 0x763   : > { %1311 = vmatprep.subr.bf16.mxu0 %v1618_v15 }
 0x764   : > { %1439 = vpow2.f32 %v781_v12 }
 0x765   : > { %v893_v27 = vpop.permute.xlu1 %892 }
 0x76c   : > { %v1438_v13 = vpop.eup %1437 }
 0x76d   : > { %v783_v14 = vsel %vm425_vm3, %v1438_v13, 0.0 }
 0x76e   : > { %v1440_v16 = vpop.eup %1439  ;;  %784 = vadd.xlane.f32.xlu0 %v783_v14  ;;  %v1214_v14 = vld [vmem:[%s2025_s4] ss:$0 sm:$0xff] }
 0x76f   : > { %v786_v17 = vsel %vm425_vm3, %v1440_v16, 0.0 }
 0x772   : > { %787 = vadd.xlane.f32.xlu0 %v786_v17 }
 0x788   : > { %894 = vrot.lane.b32.xlu0 %v1876_v35, %s1629_s13 }
 0x7fb   : > { %v785_v18 = vpop.xlane.xlu0 %784 }
 0x7fc   : > { %1441 = vrcp.f32 %v785_v18 }
 0x7ff   : > { %v788_v19 = vpop.xlane.xlu0 %787 }
 0x800   : > { %1443 = vrcp.f32 %v788_v19 }
 0x803   : > { %v895_v24 = vpop.permute.xlu0 %894 }
 0x804   : > { %v900_v26 = vsel %vm375_vm2, %v895_v24, 0 }
 0x806   : > { %v1442_v20 = vpop.eup %1441 }
 0x807   : > { %v790_v22 = vmul.f32 %v1442_v20, %v1438_v13 }
 0x80a   : > { %v1444_v21 = vpop.eup %1443 }
 0x80b   : > { %v792_v23 = vmul.f32 %v1444_v21, %v1440_v16 }
 0x80d   : > { %v793_v25 = vpack.c.bf16 %v792_v23, %v790_v22 }
 0x80f   : > { %1302 = vmatmul.mubr.msk.bf16.vlgmr.msra.gmra.mrb[16].mxu0 %vm425_vm3, %v793_v25 }
 0x810   : > { %1312 = vmatpush3.bf16.xpose.msra.mxu0 %v900_v26  ;;  %1313 = vmatprep.mubr.msk.bf16.mxu0 %vm1619_vm1, %v1618_v15 }
 0x811   : > { %1323 = vmatprep.subr.bf16.mxu0 %v1618_v15 }
 0x817   : > { %1314 = vmatmul.mubr.msk.bf16.vlgmr.msra.gmra.mrb[20].mxu0 %vm375_vm2, %v893_v27 }
 0x818   : > { %1325 = vmatprep.mubr.msk.bf16.mxu0 %vm1619_vm1, %v1618_v15  ;;  %1324 = vmatpush3.bf16.msra.mxu0 %v1021_v54 }
 0x8e2   : > { %v834_v30 = vpop.f32.mrb[16].mxu0 }
 0x8e3   : > { %v1303_v31 = vpop.f32.mrb[17].mxu0 }
 0x8e4   : > { %v837_v32 = vpop.f32.mrb[18].mxu0 }
 0x8e5   : > { %v841_v33 = vpack.c.bf16 %v837_v32, %v834_v30  ;;  %v1304_v34 = vpop.f32.mrb[19].mxu0 }
 0x8e7   : > { %1308 = vmatmul.mubr.msk.bf16.vlgmr.msra.gmra.mrb[16].mxu1 %vm375_vm2, %v841_v33 }
 0x8e8   : > { %1319 = vmatprep.mubr.msk.bf16.mxu1 %vm1619_vm1, %v1618_v15 }
 0x8ea   : > { %v936_v36 = vpop.f32.mrb[20].mxu0 }
 0x8eb   : > { %v943_v37 = vmul.f32 0.17677669, %v936_v36  ;;  %v1315_v38 = vpop.f32.mrb[21].mxu0 }
 0x8ec   : > { %v939_v39 = vpop.f32.mrb[22].mxu0 }
 0x8ed   : > { %v944_v40 = vmul.f32 0.17677669, %v939_v39  ;;  %v1316_v41 = vpop.f32.mrb[23].mxu0  ;;  %v945_v42 = vsel %vm425_vm3, %v943_v37, -inf }
 0x8ee   : > { %946 = vmax.xlane.f32.xlu1 %v945_v42 }
 0x8ef   : > { %v948_v43 = vsel %vm425_vm3, %v944_v40, -inf }
 0x8f0   : > { %949 = vmax.xlane.f32.xlu0 %v948_v43 }
 0x97b   : > { %v947_v44 = vpop.xlane.xlu1 %946 }
 0x97c   : > { %v951_v45 = vsub.f32 %v943_v37, %v947_v44 }
 0x97d   : > { %v950_v46 = vpop.xlane.xlu0 %949 }
 0x97e   : > { %v953_v47 = vmul.f32 1.442695, %v951_v45  ;;  %v952_v48 = vsub.f32 %v944_v40, %v950_v46 }
 0x980   : > { %1445 = vpow2.f32 %v953_v47  ;;  %v955_v49 = vmul.f32 1.442695, %v952_v48 }
 0x982   : > { %1447 = vpow2.f32 %v955_v49 }
 0x98a   : > { %v1446_v15 = vpop.eup %1445 }
 0x98b   : > { %v957_v50 = vsel %vm425_vm3, %v1446_v15, 0.0 }
 0x98c   : > { %v1448_v51 = vpop.eup %1447  ;;  %958 = vadd.xlane.f32.xlu0 %v957_v50 }
 0x98d   : > { %v960_v52 = vsel %vm425_vm3, %v1448_v51, 0.0 }
 0x98e   : > { %961 = vadd.xlane.f32.xlu1 %v960_v52 }
 0x9a2   : > { %968 = vrot.lane.b32.xlu0 %v1876_v35, %s1630_s7 }
 0x9ba   : > { %v883_v56 = vpop.f32.mrb[16].mxu1 }
 0x9bb   : > { %v890_v57 = vadd.f32 %v883_v56, %v1927_v55  ;;  %v1309_v59 = vpop.f32.mrb[17].mxu1 }
 0x9bc   : > { %v886_v60 = vpop.f32.mrb[18].mxu1 }
 0x9bd   : > { %v891_v61 = vadd.f32 %v886_v60, %v1929_v58  ;;  %v1310_v62 = vpop.f32.mrb[19].mxu1 }
 0xa19   : > { %v959_v63 = vpop.xlane.xlu0 %958 }
 0xa1a   : > { %1449 = vrcp.f32 %v959_v63 }
 0xa1b   : > { %v962_v2 = vpop.xlane.xlu1 %961 }
 0xa1c   : > { %1451 = vrcp.f32 %v962_v2 }
 0xa1d   : > { %v969_v3 = vpop.permute.xlu0 %968 }
 0xa1e   : > { %1318 = vmatpush3.bf16.msra.mxu1 %v969_v3 }
 0xa24   : > { %v1450_v4 = vpop.eup %1449 }
 0xa25   : > { %v964_v5 = vmul.f32 %v1450_v4, %v1446_v15 }
 0xa26   : > { %v1452_v35 = vpop.eup %1451 }
 0xa27   : > { %v966_v6 = vmul.f32 %v1452_v35, %v1448_v51 }
 0xa29   : > { %v967_v7 = vpack.c.bf16 %v966_v6, %v964_v5 }
 0xa2b   : > { %1320 = vmatmul.mubr.msk.bf16.vlgmr.msra.gmra.mrb[20].mxu1 %vm425_vm3, %v967_v7 }
 0xafe   : > { %v1008_v55 = vpop.f32.mrb[20].mxu1 }
 0xaff   : > { %v1321_v8 = vpop.f32.mrb[21].mxu1 }
 0xb00   : > { %v1011_v9 = vpop.f32.mrb[22].mxu1 }
 0xb01   : > { %v1015_v58 = vpack.c.bf16 %v1011_v9, %v1008_v55  ;;  %v1322_v10 = vpop.f32.mrb[23].mxu1 }
 0xb03   : > { %1326 = vmatmul.mubr.msk.bf16.vlgmr.msra.gmra.mrb[24].mxu0 %vm375_vm2, %v1015_v58 }
 0xbd6   : > { %v1057_v11 = vpop.f32.mrb[24].mxu0 }
 0xbd7   : > { %v1064_v12 = vadd.f32 %v1057_v11, %v890_v57  ;;  %v1327_v13 = vpop.f32.mrb[25].mxu0 }
 0xbd8   : > { %v1060_v16 = vpop.f32.mrb[26].mxu0 }
 0xbd9   : > { %v1066_v17 = vadd.f32 %v1064_v12, %v1850_v0  ;;  %v1065_v18 = vadd.f32 %v1060_v16, %v891_v61  ;;  %v1328_v19 = vpop.f32.mrb[27].mxu0 }
 0xbdb   : > { %v1075_v20 = vadd.f32 %v1214_v14, %v1066_v17  ;;  %v1067_v21 = vadd.f32 %v1065_v18, %v1852_v1 }
 0xbdd   : > { %1077 = vst.msk [vmem:[%s271_s8] sm:$0xff] %vm275_vm0, %v1075_v20  ;;  %v1076_v0 = vadd.f32 %v1214_v14, %v1067_v21 }
 0xbdf   : > { %1078 = vst.msk [vmem:[%s271_s8 + $0x8] sm:$0xff] %vm275_vm0, %v1076_v0 }
 0xbe0   : > { %1552 = shalt.err (!%p1549_p2)
}
 0xbe1   : > { %s1553_s12 = scalar_lea.hbm %s1973_s30, 256  ;;  %s1557_s6 = scalar_lea.hbm %s2026_s5, 512 }
 0xbe2   : > { %p1554_p13 = scmp.ne.s32.totalorder %s1973_s30, %s1553_s12  ;;  %p1558_p4 = scmp.lt.u32.totalorder %s1973_s30, %s2026_s5 }
 0xbe3   : > { %p1559_p5 = scmp.lt.u32.totalorder %s1557_s6, %s1553_s12  ;;  %p1561_p11 = scmp.lt.u32.totalorder %s1553_s12, %s1973_s30 }
 0xbe4   : > { %p1555_p6 = pnand %p1554_p13, %p2040_p0 }
 0xbe5   : > { %p1560_p8 = por %p1559_p5, %p1558_p4 }
 0xbe6   : > { %p1556_p10 = pneg %p1555_p6 }
 0xbe7   : > { %p1562_p1 = por %p1561_p11, %p1560_p8 }
 0xbe9   : > { %p1563_p3 = pnand %p1562_p1, %p1556_p10 }
 0xbeb   : > { %1566 = shalt.err (!%p1563_p3)
}
 0xbec   : > { %s1632_s8 = smov 128   ;;  %s1633_s11 = smov 8  }
 0xbed   : > { %1339 = dma.vmem_to_hbm [thread:$0]  (%p2040_p0), %s1975_s10, 256, %s1973_s30, %s1080_s22, %s1632_s8, %s1632_s8, %s1633_s11  }
 0xbee PF: > { %s1108_s28 = sand.u32 1, %s1597_s18   ;;  %p2041_p7 = scmp.ne.s32.totalorder %s2031_s25, 0 }
 0xbef   : > { %p2042_p9 = scmp.ge.s32.totalorder %s1609_s21, 2  ;;  %s1109_s17 = scalar_lea.sflag [#allocation4], %s1108_s28 }
 0xbf1   : > { %p1353_p12 = pnand %p2042_p9, %p2041_p7 }
 0xbf3   : > { %1592 = dma.done.wait (!%p1353_p12), %s1109_s17, 256  }
 0xbf4   : > { %1594 = vsyncadd (!%p1353_p12), %s1109_s17, 4294967040  ;;  %p19_p2 = scmp.ge.s32.totalorder %s1774_s14, 4   ;;  %s2043_s18 = smov %s1601_s19 }
 0xbf5   : > { %s2044_s19 = smov %s1605_s20  ;;  %s2045_s20 = smov %s1790_s27 }
 0xbf6   : > { %s2046_s21 = smov %s1774_s14  ;;  %21 = sbr.rel (!%p19_p2) target bundleno = 6 (0x6), region = 93 }
 0xbfd   :  { %1114 = vsyncpa [#allocation3], 1 }
 0xbfe   :  { %1116 = vsyncpa [#allocation3 + $0x1], 1 }
 0xbff   :  { %1117 = vsyncpa [#allocation6], 1 }
 0xc00   :  { %1118 = vsyncpa [#allocation4], 1 }
 0xc01   :  { %1120 = vsyncpa [#allocation4 + $0x1], 1 }

</bundles_post_ra>
